<compile_context>
chip_gen: v6e
topology: v6e:2x2x1
jax: 0.10.0
libtpu: 0.0.40
codegen_flags: <defaults>
</compile_context>

<pallas_src>
import functools

import numpy as np
import jax
import jax.numpy as jnp
from jax import lax
from jax.experimental import pallas as pl
from jax.experimental.pallas import tpu as pltpu

NEG_SLOPE = 0.01                    # nn.LeakyReLU default negative slope
_VMEM_LIMIT = 48 * 1024 * 1024      # safe on v5e/v6e (128 MiB) and v7x (64 MiB)


def _leaky(x):
    return jnp.where(x > 0, x, NEG_SLOPE * x)


def _pick_heads_per_block(L, target_rows=1024):
    """Largest divisor `d` of L with d*L <= ~target_rows and d*L a multiple of 8."""
    cap = max(1, min(L, target_rows // max(L, 1)))
    for d in range(cap, 0, -1):
        if L % d == 0 and (d * L) % 8 == 0:
            return d
    return L   # whole-array block (always a legal BlockSpec)


# --------------------------------------------------------------------------
# Kernel 1: arc representations (memory bank), tiled over head blocks.
#   arcs are head-major: p = head * L + dep
#   mem[p] = LeakyReLU( w[p]*(Hh[head] + Hd[dep]) + energy[p] @ W_rel_comb + b )
# --------------------------------------------------------------------------
def arc_kernel(e_ref, w_ref, hh_ref, hd_ref, wrel_ref, b_ref, out_ref,
               *, heads_per_block):
    # e_ref   : (TH*L, R)   per-arc energies
    # w_ref   : (TH*L, 1)   marginal-energy weight per arc
    # hh_ref  : (TH, Hw)    wh @ W_head^T   rows for this head block
    # hd_ref  : (L,  Hw)    wh @ W_dep^T    (all dep rows, resident across blocks)
    # wrel_ref: (R,  Hw)    rel_embs @ W_rel^T  (folded at init)
    # b_ref   : (1,  Hw)    arc_composer bias
    # out_ref : (TH*L, Hw)  memory-bank block (bf16)
    hh = hh_ref[...]
    hd = hd_ref[...]
    # base[p] = Hh[p // L] + Hd[p % L]   (head-major inside the block)
    base = jnp.concatenate(
        [hd + hh[t:t + 1, :] for t in range(heads_per_block)], axis=0)
    rel = jnp.dot(e_ref[...], wrel_ref[...], preferred_element_type=jnp.float32)
    pre = w_ref[...] * base + rel + b_ref[...]
    out_ref[...] = _leaky(pre).astype(out_ref.dtype)   # dropout == identity (eval)


# --------------------------------------------------------------------------
# Kernel 2: memory hopping.  grid = (hops,), one hop per grid step.
#   Per-hop weights are streamed (double-buffered); mem / mask / x stay resident.
#   The output block carries x across hops (constant out index_map).
# --------------------------------------------------------------------------
def hop_kernel(x0_ref, mem_ref, mask_ref, wkv_ref, bkv_ref, wh_ref, bh_ref,
               out_ref, *, half):
    @pl.when(pl.program_id(0) == 0)
    def _():
        out_ref[...] = x0_ref[...]

    x = out_ref[...]                                              # (1, 2H) f32
    kv = jnp.dot(x, wkv_ref[0], preferred_element_type=jnp.float32) + bkv_ref[0]
    key = jnp.tanh(kv[:, :half])                                  # (1, H)
    value = _leaky(kv[:, half:])                                  # (1, H)

    mem = mem_ref[...]                                            # (N, H) bf16
    mask = mask_ref[...]                                          # (N, 1) f32
    # arc logits on the MXU: (N, H) x (1, H)^T -> (N, 1)
    logits = lax.dot_general(
        mem, key.astype(mem.dtype),
        dimension_numbers=(((1,), (1,)), ((), ())),
        preferred_element_type=jnp.float32)
    logits = jnp.where(mask > 0, logits, jnp.float32(-1e30))
    m = jnp.max(logits, axis=0, keepdims=True)                    # (1, 1)
    ex = jnp.where(mask > 0, jnp.exp(logits - m), 0.0)            # (N, 1)
    denom = jnp.sum(ex, axis=0, keepdims=True)                    # (1, 1)
    # weighted read on the MXU: (1, N) x (N, H) -> (1, H)
    acc = lax.dot_general(
        ex.astype(mem.dtype), mem,
        dimension_numbers=(((0,), (0,)), ((), ())),
        preferred_element_type=jnp.float32)
    mem_rep = acc * pl.reciprocal(denom, approx=True)             # (1, H)

    cat = jnp.concatenate([value, mem_rep], axis=1)               # (1, 2H)
    out_ref[...] = _leaky(
        jnp.dot(cat, wh_ref[0], preferred_element_type=jnp.float32) + bh_ref[0])


# --------------------------------------------------------------------------
# Module wrapper
# --------------------------------------------------------------------------
class MemoryRelPallas:
    def __init__(self, num_dep_rels, dep_rel_emb_size=15, hops=3, in_size=256,
                 energy_threshold=1e-6, mem_dtype=jnp.bfloat16, seed=42):
        self.num_dep_rels = num_dep_rels
        self.dep_rel_emb_size = dep_rel_emb_size
        self.hops = hops
        self.in_size = in_size
        self.energy_threshold = energy_threshold
        self.mem_dtype = mem_dtype
        self.hw = 2 * in_size          # word-representation hidden size
        self.hh = 4 * in_size          # hopping hidden size

        key = jax.random.PRNGKey(seed)
        keys = jax.random.split(key, 2 + 2 * hops)

        def linear(k, fan_in, fan_out):
            kw, kb = jax.random.split(k)
            bound = 1.0 / np.sqrt(fan_in)
            W = jax.random.uniform(kw, (fan_out, fan_in), jnp.float32, -bound, bound)
            b = jax.random.uniform(kb, (fan_out,), jnp.float32, -bound, bound)
            return W, b

        # arc_composer: Linear(4*in_size + emb, 2*in_size)
        self.W_ac, self.b_ac = linear(keys[0], self.hh + dep_rel_emb_size, self.hw)
        W_acT = self.W_ac.T                                        # (2Hw+emb, Hw)
        self.W_head_T = W_acT[:self.hw]                            # (Hw, Hw)
        self.W_rel_T = W_acT[self.hw:self.hw + dep_rel_emb_size]   # (emb, Hw)
        self.W_dep_T = W_acT[self.hw + dep_rel_emb_size:]          # (Hw, Hw)

        # relation embeddings (kaiming-normal-like deterministic init)
        self.rel_embs = (jax.random.normal(keys[1], (num_dep_rels, dep_rel_emb_size),
                                           jnp.float32)
                         * np.sqrt(2.0 / dep_rel_emb_size))
        # fold the rel-embedding projection:  (R, emb) @ (emb, Hw) -> (R, Hw)
        self.W_rel_comb = jnp.dot(self.rel_embs, self.W_rel_T)

        wkv_t, bkv, wh_t, bh = [], [], [], []
        for i in range(hops):
            Wkv, bk = linear(keys[2 + 2 * i], self.hh, self.hh)
            Wh, bhd = linear(keys[3 + 2 * i], self.hh, self.hh)
            wkv_t.append(Wkv.T)
            bkv.append(bk[None, :])
            wh_t.append(Wh.T)
            bh.append(bhd[None, :])
        self.WkvT = jnp.stack(wkv_t)     # (hops, 2H, 2H)
        self.bkv = jnp.stack(bkv)        # (hops, 1, 2H)
        self.WhT = jnp.stack(wh_t)       # (hops, 2H, 2H)
        self.bh = jnp.stack(bh)          # (hops, 1, 2H)

    # ----- Pallas call helpers -----
    def _build_mem_bank(self, e_arcs, w_col, hh, hd, L):
        R = self.num_dep_rels
        hw = self.hw
        n = L * L
        th = _pick_heads_per_block(L)
        rows = th * L
        kern = functools.partial(arc_kernel, heads_per_block=th)
        return pl.pallas_call(
            kern,
            out_shape=jax.ShapeDtypeStruct((n, hw), self.mem_dtype),
            grid=(L // th,),
            in_specs=[
                pl.BlockSpec((rows, R), lambda i: (i, 0)),      # per-arc energies
                pl.BlockSpec((rows, 1), lambda i: (i, 0)),      # per-arc weight
                pl.BlockSpec((th, hw), lambda i: (i, 0)),       # Hh rows of this block
                pl.BlockSpec((L, hw), lambda i: (0, 0)),        # Hd (resident)
                pl.BlockSpec((R, hw), lambda i: (0, 0)),        # folded rel projection
                pl.BlockSpec((1, hw), lambda i: (0, 0)),        # bias
            ],
            out_specs=pl.BlockSpec((rows, hw), lambda i: (i, 0)),
            compiler_params=pltpu.CompilerParams(
                dimension_semantics=("parallel",),
                vmem_limit_bytes=_VMEM_LIMIT),
        )(e_arcs, w_col, hh, hd, self.W_rel_comb, self.b_ac[None, :])

    def _hopping(self, x0, mem_bank, mask):
        n = mem_bank.shape[0]
        hw, hh = self.hw, self.hh
        kern = functools.partial(hop_kernel, half=hw)
        return pl.pallas_call(
            kern,
            out_shape=jax.ShapeDtypeStruct((1, hh), jnp.float32),
            grid=(self.hops,),
            in_specs=[
                pl.BlockSpec((1, hh), lambda i: (0, 0)),           # x0
                pl.BlockSpec((n, hw), lambda i: (0, 0)),           # mem bank (resident)
                pl.BlockSpec((n, 1), lambda i: (0, 0)),            # arc mask (resident)
                pl.BlockSpec((1, hh, hh), lambda i: (i, 0, 0)),    # WkvT[i]
                pl.BlockSpec((1, 1, hh), lambda i: (i, 0, 0)),     # bkv[i]
                pl.BlockSpec((1, hh, hh), lambda i: (i, 0, 0)),    # WhT[i]
                pl.BlockSpec((1, 1, hh), lambda i: (i, 0, 0)),     # bh[i]
            ],
            out_specs=pl.BlockSpec((1, hh), lambda i: (0, 0)),
            compiler_params=pltpu.CompilerParams(
                dimension_semantics=("arbitrary",),
                vmem_limit_bytes=_VMEM_LIMIT),
        )(x0, mem_bank, mask, self.WkvT, self.bkv, self.WhT, self.bh)

    # ----- forward -----
    def __call__(self, energy, word_h, e1, e2, sent_len):
        # TODO(synk): pad/bucket sent_len to avoid a recompile per distinct length.
        L = int(sent_len)
        R = self.num_dep_rels
        e = energy[0, :, :L, :L]                          # (R, L, L)
        marginal = jnp.sum(e, axis=0)                     # (L, L)

        # Threshold retry without a host sync: first of {t, t/10, t/100} that keeps arcs.
        t0 = jnp.float32(self.energy_threshold)
        thr = jnp.where(jnp.any(marginal > t0), t0,
                        jnp.where(jnp.any(marginal > t0 * 0.1), t0 * 0.1, t0 * 0.01))
        # TODO(synk): the PyTorch exception when even t0*0.01 keeps no arcs (and the
        # "number of filtered arcs" print) would need a device->host sync; omitted.
        mask = (marginal > thr).astype(jnp.float32).reshape(L * L, 1)

        wh = word_h[0, :L, :]                             # (L, Hw)
        # Factor the arc composer: (wh[h]*w)@Wh^T + (wh[d]*w)@Wd^T == w*(Hh[h]+Hd[d])
        hh = jnp.dot(wh, self.W_head_T)                   # (L, Hw)
        hd = jnp.dot(wh, self.W_dep_T)                    # (L, Hw)
        w_col = marginal.reshape(L * L, 1)
        e_arcs = e.reshape(R, L * L).T                    # (L*L, R), head-major arcs

        mem_bank = self._build_mem_bank(e_arcs, w_col, hh, hd, L)

        x0 = jnp.concatenate([e1, e2], axis=0)[None, :]   # (1, 4*in_size)
        out = self._hopping(x0, mem_bank, mask)
        return out[0]                                     # (4*in_size,)


# --------------------------------------------------------------------------
# Pure numpy reference (mirrors the PyTorch forward, gathering real arcs)
# --------------------------------------------------------------------------
def reference_forward(model, energy, word_h, e1, e2, sent_len):
    def leaky(x):
        return np.where(x > 0, x, NEG_SLOPE * x)

    L = int(sent_len)
    e = np.asarray(energy, np.float64)[0, :, :L, :L]
    marginal = e.sum(0)
    thr = model.energy_threshold
    for _ in range(3):
        status = marginal > thr
        if status.sum() != 0:
            break
        thr *= 0.1
    heads, deps = np.nonzero(status)
    wh = np.asarray(word_h, np.float64)[0, :L, :]
    w = marginal[heads, deps][:, None]
    rels = e[:, heads, deps].T @ np.asarray(model.rel_embs, np.float64)
    allt = np.concatenate([wh[heads] * w, rels, wh[deps] * w], axis=1)
    arc = allt @ np.asarray(model.W_ac, np.float64).T + np.asarray(model.b_ac, np.float64)
    mem = leaky(arc)

    x = np.concatenate([np.asarray(e1, np.float64), np.asarray(e2, np.float64)])
    half = model.hw
    for i in range(model.hops):
        kv = x @ np.asarray(model.WkvT[i], np.float64) + np.asarray(model.bkv[i][0], np.float64)
        key = np.tanh(kv[:half])
        value = leaky(kv[half:])
        logits = mem @ key
        logits = logits - logits.max()
        d = np.exp(logits) / np.exp(logits).sum()
        mem_rep = d @ mem
        x = leaky(np.concatenate([value, mem_rep])
                  @ np.asarray(model.WhT[i], np.float64)
                  + np.asarray(model.bh[i][0], np.float64))
    return x


# --------------------------------------------------------------------------
if __name__ == "__main__":
    in_size = 32
    num_dep_rels = 4
    L = 8
    hw = 2 * in_size

    model = MemoryRelPallas(num_dep_rels=num_dep_rels, dep_rel_emb_size=15,
                            hops=3, in_size=in_size)

    key = jax.random.PRNGKey(0)
    k1, k2, k3, k4 = jax.random.split(key, 4)
    energy = jax.random.uniform(k1, (1, num_dep_rels, L, L), jnp.float32)
    # zero out a couple of arcs so the threshold filter actually removes something
    energy = energy.at[:, :, 0, 1].set(0.0).at[:, :, 3, 5].set(0.0)
    word_h = jax.random.normal(k2, (1, L, hw), jnp.float32)
    e1 = jax.random.normal(k3, (hw,), jnp.float32)
    e2 = jax.random.normal(k4, (hw,), jnp.float32)
    sent_len = L

    out = model(energy, word_h, e1, e2, sent_len)
    out = jax.block_until_ready(out)

    ref = reference_forward(model, energy, word_h, e1, e2, sent_len)
    # memory bank is stored in bf16 -> slightly looser tolerance than pure f32
    np.testing.assert_allclose(np.asarray(out, np.float64), ref, rtol=5e-2, atol=5e-2)

    print("KERNEL_OK")
</pallas_src>

<mosaic_0001>
module attributes {stable_mosaic.version = 11 : i64} {
  func.func @arc_kernel(%arg0: i32, %arg1: memref<64x4xf32, #tpu.memory_space<vmem>>, %arg2: memref<64x1xf32, #tpu.memory_space<vmem>>, %arg3: memref<8x64xf32, #tpu.memory_space<vmem>>, %arg4: memref<8x64xf32, #tpu.memory_space<vmem>>, %arg5: memref<4x64xf32, #tpu.memory_space<vmem>>, %arg6: memref<1x64xf32, #tpu.memory_space<vmem>>, %arg7: memref<64x64xbf16, #tpu.memory_space<vmem>>) attributes {dimension_semantics = [#tpu.dimension_semantics<parallel>], iteration_bounds = array<i64: 1>, scalar_prefetch = 0 : i64, scratch_operands = 0 : i64, tpu.core_type = #tpu.core_type<tc>, window_params = [{transform_indices = @transform_0, window_bounds = array<i64: 64, 4>}, {transform_indices = @transform_1, window_bounds = array<i64: 64, 1>}, {transform_indices = @transform_2, window_bounds = array<i64: 8, 64>}, {pipeline_mode = #tpu.pipeline_mode<synchronous>, transform_indices = @transform_3, window_bounds = array<i64: 8, 64>}, {pipeline_mode = #tpu.pipeline_mode<synchronous>, transform_indices = @transform_4, window_bounds = array<i64: 4, 64>}, {pipeline_mode = #tpu.pipeline_mode<synchronous>, transform_indices = @transform_5, window_bounds = array<i64: 1, 64>}, {transform_indices = @transform_6, window_bounds = array<i64: 64, 64>}]} {
    %c0 = arith.constant 0 : index
    %c0_0 = arith.constant 0 : index
    %0 = vector.load %arg3[%c0, %c0_0] : memref<8x64xf32, #tpu.memory_space<vmem>>, vector<8x64xf32>
    %c0_1 = arith.constant 0 : index
    %c0_2 = arith.constant 0 : index
    %1 = vector.load %arg4[%c0_1, %c0_2] : memref<8x64xf32, #tpu.memory_space<vmem>>, vector<8x64xf32>
    %2 = vector.extract_strided_slice %0 {offsets = [0, 0], sizes = [1, 64], strides = [1, 1]} : vector<8x64xf32> to vector<1x64xf32>
    %3 = vector.broadcast %2 : vector<1x64xf32> to vector<8x64xf32>
    %4 = arith.addf %1, %3 : vector<8x64xf32>
    %5 = vector.extract_strided_slice %0 {offsets = [1, 0], sizes = [1, 64], strides = [1, 1]} : vector<8x64xf32> to vector<1x64xf32>
    %6 = vector.broadcast %5 : vector<1x64xf32> to vector<8x64xf32>
    %7 = arith.addf %1, %6 : vector<8x64xf32>
    %8 = vector.extract_strided_slice %0 {offsets = [2, 0], sizes = [1, 64], strides = [1, 1]} : vector<8x64xf32> to vector<1x64xf32>
    %9 = vector.broadcast %8 : vector<1x64xf32> to vector<8x64xf32>
    %10 = arith.addf %1, %9 : vector<8x64xf32>
    %11 = vector.extract_strided_slice %0 {offsets = [3, 0], sizes = [1, 64], strides = [1, 1]} : vector<8x64xf32> to vector<1x64xf32>
    %12 = vector.broadcast %11 : vector<1x64xf32> to vector<8x64xf32>
    %13 = arith.addf %1, %12 : vector<8x64xf32>
    %14 = vector.extract_strided_slice %0 {offsets = [4, 0], sizes = [1, 64], strides = [1, 1]} : vector<8x64xf32> to vector<1x64xf32>
    %15 = vector.broadcast %14 : vector<1x64xf32> to vector<8x64xf32>
    %16 = arith.addf %1, %15 : vector<8x64xf32>
    %17 = vector.extract_strided_slice %0 {offsets = [5, 0], sizes = [1, 64], strides = [1, 1]} : vector<8x64xf32> to vector<1x64xf32>
    %18 = vector.broadcast %17 : vector<1x64xf32> to vector<8x64xf32>
    %19 = arith.addf %1, %18 : vector<8x64xf32>
    %20 = vector.extract_strided_slice %0 {offsets = [6, 0], sizes = [1, 64], strides = [1, 1]} : vector<8x64xf32> to vector<1x64xf32>
    %21 = vector.broadcast %20 : vector<1x64xf32> to vector<8x64xf32>
    %22 = arith.addf %1, %21 : vector<8x64xf32>
    %23 = vector.extract_strided_slice %0 {offsets = [7, 0], sizes = [1, 64], strides = [1, 1]} : vector<8x64xf32> to vector<1x64xf32>
    %24 = vector.broadcast %23 : vector<1x64xf32> to vector<8x64xf32>
    %25 = arith.addf %1, %24 : vector<8x64xf32>
    %26 = tpu.concatenate %4, %7, %10, %13, %16, %19, %22, %25 in 0 : vector<8x64xf32>, vector<8x64xf32>, vector<8x64xf32>, vector<8x64xf32>, vector<8x64xf32>, vector<8x64xf32>, vector<8x64xf32>, vector<8x64xf32> -> vector<64x64xf32>
    %c0_3 = arith.constant 0 : index
    %c0_4 = arith.constant 0 : index
    %27 = vector.load %arg1[%c0_3, %c0_4] : memref<64x4xf32, #tpu.memory_space<vmem>>, vector<64x4xf32>
    %c0_5 = arith.constant 0 : index
    %c0_6 = arith.constant 0 : index
    %28 = vector.load %arg5[%c0_5, %c0_6] : memref<4x64xf32, #tpu.memory_space<vmem>>, vector<4x64xf32>
    %cst = arith.constant dense<0.000000e+00> : vector<64x64xf32>
    %29 = tpu.matmul %27, %28, %cst {dimension_numbers = #tpu.dot_dimension_numbers<[1], [0], [0], [1], [0, 0, 1, 1], [], []>} : vector<64x4xf32>, vector<4x64xf32>, vector<64x64xf32> -> vector<64x64xf32>
    %c0_7 = arith.constant 0 : index
    %c0_8 = arith.constant 0 : index
    %30 = vector.load %arg2[%c0_7, %c0_8] : memref<64x1xf32, #tpu.memory_space<vmem>>, vector<64x1xf32>
    %31 = vector.broadcast %30 : vector<64x1xf32> to vector<64x64xf32>
    %32 = arith.mulf %31, %26 : vector<64x64xf32>
    %33 = arith.addf %32, %29 : vector<64x64xf32>
    %c0_9 = arith.constant 0 : index
    %c0_10 = arith.constant 0 : index
    %34 = vector.load %arg6[%c0_9, %c0_10] : memref<1x64xf32, #tpu.memory_space<vmem>>, vector<1x64xf32>
    %35 = vector.broadcast %34 : vector<1x64xf32> to vector<64x64xf32>
    %36 = arith.addf %33, %35 : vector<64x64xf32>
    %cst_11 = arith.constant 0.000000e+00 : f32
    %37 = vector.broadcast %cst_11 : f32 to vector<64x64xf32>
    %38 = arith.cmpf ogt, %36, %37 : vector<64x64xf32>
    %cst_12 = arith.constant 0.00999999977 : f32
    %39 = vector.broadcast %cst_12 : f32 to vector<64x64xf32>
    %40 = arith.mulf %39, %36 : vector<64x64xf32>
    %41 = arith.select %38, %36, %40 : vector<64x64xi1>, vector<64x64xf32>
    %42 = arith.truncf %41 : vector<64x64xf32> to vector<64x64xbf16>
    %c0_13 = arith.constant 0 : index
    %c0_14 = arith.constant 0 : index
    %43 = vector.load %arg7[%c0_13, %c0_14] : memref<64x64xbf16, #tpu.memory_space<vmem>>, vector<64x64xbf16>
    tpu.vector_store %arg7[%c0_13, %c0_14], %42 {strides = array<i32>} : memref<64x64xbf16, #tpu.memory_space<vmem>>, vector<64x64xbf16>,
    return
  }
  func.func @transform_0(%arg0: i32) -> (i32, i32) {
    %c0_i32 = arith.constant 0 : i32
    %c0_i32_0 = arith.constant 0 : i32
    return %arg0, %c0_i32 : i32, i32
  }
  func.func @transform_1(%arg0: i32) -> (i32, i32) {
    %c0_i32 = arith.constant 0 : i32
    %c0_i32_0 = arith.constant 0 : i32
    return %arg0, %c0_i32 : i32, i32
  }
  func.func @transform_2(%arg0: i32) -> (i32, i32) {
    %c0_i32 = arith.constant 0 : i32
    %c0_i32_0 = arith.constant 0 : i32
    return %arg0, %c0_i32 : i32, i32
  }
  func.func @transform_3(%arg0: i32) -> (i32, i32) {
    %c0_i32 = arith.constant 0 : i32
    %c0_i32_0 = arith.constant 0 : i32
    %c0_i32_1 = arith.constant 0 : i32
    return %c0_i32, %c0_i32_0 : i32, i32
  }
  func.func @transform_4(%arg0: i32) -> (i32, i32) {
    %c0_i32 = arith.constant 0 : i32
    %c0_i32_0 = arith.constant 0 : i32
    %c0_i32_1 = arith.constant 0 : i32
    return %c0_i32, %c0_i32_0 : i32, i32
  }
  func.func @transform_5(%arg0: i32) -> (i32, i32) {
    %c0_i32 = arith.constant 0 : i32
    %c0_i32_0 = arith.constant 0 : i32
    %c0_i32_1 = arith.constant 0 : i32
    return %c0_i32, %c0_i32_0 : i32, i32
  }
  func.func @transform_6(%arg0: i32) -> (i32, i32) {
    %c0_i32 = arith.constant 0 : i32
    %c0_i32_0 = arith.constant 0 : i32
    return %arg0, %c0_i32 : i32, i32
  }
}

</mosaic_0001>

<bundles_post_ra>
// kernel: tpu_custom_call.1
= control target key start
LH: loop header
LB: loop body
LE: loop exit
PB: predicated region body
PF: predicated region fallthrough
CT: control target
= control target key end

     0   :  { %vm100_vm0 = vcmask 1043456   ;;  %vm75_vm1 = vcmask 31744   ;;  %v448_v11 = vmov 0   ;;  %s566_s0 = inlined_call_operand.vmem [shape: f32[64,4], index: 0, kind: input, shape index: {}]   ;;  %s567_s1 = inlined_call_operand.vmem [shape: f32[64,1], index: 1, kind: input, shape index: {}]   ;;  %s568_s2 = inlined_call_operand.vmem [shape: f32[8,64], index: 2, kind: input, shape index: {}]   ;;  %s569_s3 = inlined_call_operand.vmem [shape: f32[8,64], index: 3, kind: input, shape index: {}]   ;;  %s570_s4 = inlined_call_operand.vmem [shape: f32[4,64], index: 4, kind: input, shape index: {}]   ;;  %s571_s5 = inlined_call_operand.vmem [shape: f32[1,64], index: 5, kind: input, shape index: {}]   ;;  %s572_s6 = inlined_call_operand.hbm [shape: bf16[64,64], index: 6, kind: output, shape index: {}]  }
   0x1   :  { %v74_v0 = vld [vmem:[%s570_s4] sm:$0xf]  ;;  %v67_v3 = vld [vmem:[%s566_s0 + $0x8] sm:$0xff]  ;;  %v68_v5 = vld [vmem:[%s566_s0 + $0x10] sm:$0xff]  ;;  %425 = vset.pattern.permute.xlu1 %v448_v11  ;;  %424 = vset.pattern.permute.xlu0 %v448_v11 }
   0x2   :  { %v66_v1 = vld [vmem:[%s566_s0] sm:$0xff]  ;;  %404 = vmatprep.subr.msk.mxu0 %vm100_vm0, %v74_v0  ;;  %418 = vmatprep.subr.msk.mxu1 %vm100_vm0, %v74_v0  ;;  %v71_v4 = vld [vmem:[%s566_s0 + $0x28] sm:$0xff]  ;;  %v72_v6 = vld [vmem:[%s566_s0 + $0x30] sm:$0xff] }
   0x3   :  { %v70_v2 = vld [vmem:[%s566_s0 + $0x20] sm:$0xff]  ;;  %405 = vmatpush3.msk.msra.mxu0 %vm100_vm0, %v74_v0  ;;  %419 = vmatpush3.msk.msra.mxu1 %vm100_vm0, %v74_v0  ;;  %v211_v7 = vld [vmem:[%s567_s1 + $0x10] sm:$0xff]  ;;  %v69_v9 = vld [vmem:[%s566_s0 + $0x18] sm:$0xff] }
   0x4   :  { %406 = vmatprep.mubr.msk.f32.mxu0 %vm75_vm1, %v66_v1  ;;  %412 = vmatprep.mubr.msk.f32.mxu1 %vm75_vm1, %v70_v2  ;;  %v209_v8 = vld [vmem:[%s567_s1] sm:$0xff]  ;;  %v73_v10 = vld [vmem:[%s566_s0 + $0x38] sm:$0xff] }
   0x5   :  { %407 = vmatmul.mubr.msk.f32.vlgmr.msra.gmra.mxu0 %vm75_vm1, %v67_v3  ;;  %413 = vmatmul.mubr.msk.f32.vlgmr.msra.gmra.mxu1 %vm75_vm1, %v71_v4 }
   0x6   :  { %409 = vmatprep.mubr.msk.f32.mxu0 %vm75_vm1, %v68_v5  ;;  %415 = vmatprep.mubr.msk.f32.mxu1 %vm75_vm1, %v72_v6 }
   0x7   :  { %11 = vsyncpa [#allocation3], 0  ;;  %229 = vperm.xlu1 %425, %v211_v7   ;;  %219 = vperm.xlu0 %424, %v209_v8   ;;  %v212_v12 = vld [vmem:[%s567_s1 + $0x18] sm:$0xff]  ;;  %v210_v13 = vld [vmem:[%s567_s1 + $0x8] sm:$0xff]  ;;  %v26_v18 = vlaneseq  ;;  %vm344_vm2 = vcmask 519168  }
   0x8   :  { %v214_v14 = vld [vmem:[%s567_s1 + $0x28] sm:$0xff]  ;;  %v213_v15 = vld [vmem:[%s567_s1 + $0x20] sm:$0xff]  ;;  %v216_v16 = vld [vmem:[%s567_s1 + $0x38] sm:$0xff] }
   0x9   :  { %410 = vmatmul.mubr.msk.f32.gmra.mxu0 %vm75_vm1, %v69_v9  ;;  %416 = vmatmul.mubr.msk.f32.gmra.mxu1 %vm75_vm1, %v73_v10  ;;  %v215_v17 = vld [vmem:[%s567_s1 + $0x30] sm:$0xff]  ;;  %v27_v20 = vshrl.u32 %v26_v18, 7  ;;  %v24_v24 = vld [vmem:[%s568_s2] sm:$0xff] }
   0xa   :  { %v25_v31 = vld [vmem:[%s569_s3] sm:$0xff] }
   0xb   :  { %234 = vperm.xlu1 %425, %v212_v12   ;;  %224 = vperm.xlu0 %424, %v210_v13   ;;  %v33_v22 = vsub.s32 1, %v27_v20  ;;  %v53_v23 = vsub.s32 5, %v27_v20  ;;  %v28_v25 = vsub.s32 0, %v27_v20  ;;  %v48_v28 = vsub.s32 4, %v27_v20  ;;  %v378_v55 = vld [vmem:[%s571_s5] ss:$0 sm:$0xff] }
   0xc   :  { %v38_v32 = vsub.s32 2, %v27_v20  ;;  %v43_v33 = vsub.s32 3, %v27_v20  ;;  %v63_v34 = vsub.s32 7, %v27_v20  ;;  %v58_v35 = vsub.s32 6, %v27_v20  ;;  %s449_s5 = smov [#allocation2]  }
   0xd   :  { %v34_v29 = vrot.slane %v24_v24, %v33_v22  ;;  %v54_v30 = vrot.slane %v24_v24, %v53_v23  ;;  %v29_v36 = vrot.slane %v24_v24, %v28_v25  ;;  %v49_v37 = vrot.slane %v24_v24, %v48_v28  ;;  %s358_s7 = sshll.u32 %s449_s5, 4  ;;  %s359_s7 = int_to_ptr.vmem [resolvable:$true] %s358_s7 }
   0xe   :  { %v39_v42 = vrot.slane %v24_v24, %v38_v32  ;;  %v44_v43 = vrot.slane %v24_v24, %v43_v33  ;;  %v64_v44 = vrot.slane %v24_v24, %v63_v34  ;;  %v59_v45 = vrot.slane %v24_v24, %v58_v35  ;;  %s426_s8 = scalar_lea.vmem %s359_s7, 512  ;;  %p431_p1 = scmp.lt.s32.totalorder %s359_s7, %s359_s7 }
   0xf   :  { %244 = vperm.xlu1 %425, %v214_v14   ;;  %239 = vperm.xlu0 %424, %v213_v15   ;;  %v35_v38 = vadd.f32 %v34_v29, %v25_v31  ;;  %v55_v40 = vadd.f32 %v54_v30, %v25_v31  ;;  %v30_v46 = vadd.f32 %v29_v36, %v25_v31  ;;  %p427_p0 = scmp.ne.s32.totalorder %s359_s7, %s426_s8  ;;  %p432_p2 = scmp.lt.s32.totalorder %s426_s8, %s426_s8 }
  0x10   :  { %v50_v47 = vadd.f32 %v49_v37, %v25_v31  ;;  %v40_v50 = vadd.f32 %v39_v42, %v25_v31  ;;  %v45_v51 = vadd.f32 %v44_v43, %v25_v31  ;;  %v65_v52 = vadd.f32 %v64_v44, %v25_v31 }
  0x11   :  { %v60_v53 = vadd.f32 %v59_v45, %v25_v31  ;;  %p433_p3 = por %p432_p2, %p431_p1 }
  0x13   :  { %254 = vperm.xlu1 %425, %v216_v16   ;;  %249 = vperm.xlu0 %424, %v215_v17   ;;  %p434_p4 = pnand %p433_p3, %p427_p0 }
  0x82   :  { %v230_v19 = vpop.permute.xlu1 %229  ;;  %v220_v21 = vpop.permute.xlu0 %219 }
  0x83   :  { %v257_v57 = vmul.f32 %v220_v21, %v30_v46  ;;  %v259_v5 = vmul.f32 %v230_v19, %v40_v50 }
  0x86   :  { %v235_v26 = vpop.permute.xlu1 %234  ;;  %v225_v27 = vpop.permute.xlu0 %224 }
  0x87   :  { %v258_v48 = vmul.f32 %v225_v27, %v35_v38  ;;  %v260_v6 = vmul.f32 %v235_v26, %v45_v51 }
  0x8a   :  { %v245_v39 = vpop.permute.xlu1 %244  ;;  %v240_v41 = vpop.permute.xlu0 %239 }
  0x8b   :  { %v262_v49 = vmul.f32 %v245_v39, %v55_v40  ;;  %v261_v58 = vmul.f32 %v240_v41, %v50_v47 }
  0x8e   :  { %v255_v59 = vpop.permute.xlu1 %254  ;;  %v250_v60 = vpop.permute.xlu0 %249 }
  0x8f   :  { %v264_v7 = vmul.f32 %v255_v59, %v65_v52  ;;  %v263_v8 = vmul.f32 %v250_v60, %v60_v53 }
  0xc5   :  { %v408_v54 = vpop.f32.mrf.mxu0  ;;  %v414_v56 = vpop.f32.mrf.mxu1 }
  0xc6   :  { %v266_v61 = vadd.f32 %v408_v54, %v258_v48  ;;  %v270_v62 = vadd.f32 %v414_v56, %v262_v49 }
  0xc7   :  { %v170_v63 = vpop.f32.mrf.mxu0  ;;  %v190_v0 = vpop.f32.mrf.mxu1 }
  0xc8   :  { %v281_v1 = vadd.f32 %v378_v55, %v266_v61  ;;  %v285_v2 = vadd.f32 %v378_v55, %v270_v62  ;;  %v265_v3 = vadd.f32 %v257_v57, %v170_v63  ;;  %v269_v4 = vadd.f32 %v261_v58, %v190_v0 }
  0xc9   :  { %v411_v9 = vpop.f32.mrf.mxu0  ;;  %v417_v10 = vpop.f32.mrf.mxu1 }
  0xca   :  { %vm289_vm3 = vcmp.gt.f32.partialorder %v281_v1, 0.0  ;;  %v297_v11 = vmul.f32 0.01, %v281_v1  ;;  %vm293_vm4 = vcmp.gt.f32.partialorder %v285_v2, 0.0  ;;  %v301_v12 = vmul.f32 0.01, %v285_v2 }
  0xcb   :  { %v280_v13 = vadd.f32 %v378_v55, %v265_v3  ;;  %v284_v14 = vadd.f32 %v378_v55, %v269_v4  ;;  %v268_v15 = vadd.f32 %v411_v9, %v260_v6  ;;  %v272_v16 = vadd.f32 %v417_v10, %v264_v7  ;;  %v180_v17 = vpop.f32.mrf.mxu0  ;;  %v200_v18 = vpop.f32.mrf.mxu1 }
  0xcc   :  { %v305_v20 = vsel %vm289_vm3, %v281_v1, %v297_v11  ;;  %v309_v21 = vsel %vm293_vm4, %v285_v2, %v301_v12  ;;  %v267_v22 = vadd.f32 %v259_v5, %v180_v17  ;;  %v271_v23 = vadd.f32 %v263_v8, %v200_v18 }
  0xcd   :  { %v388_v19 = vpack.c.bf16 %v305_v20, %v305_v20  ;;  %v392_v24 = vpack.c.bf16 %v309_v21, %v309_v21  ;;  %vm288_vm5 = vcmp.gt.f32.partialorder %v280_v13, 0.0  ;;  %v296_v25 = vmul.f32 0.01, %v280_v13 }
  0xce   :  { %vm292_vm6 = vcmp.gt.f32.partialorder %v284_v14, 0.0  ;;  %v300_v26 = vmul.f32 0.01, %v284_v14  ;;  %v283_v27 = vadd.f32 %v378_v55, %v268_v15  ;;  %v287_v28 = vadd.f32 %v378_v55, %v272_v16 }
  0xcf   :  { %346 = vst.msk [vmem:[#allocation2 + $0x4] sm:$0xf] %vm344_vm2, %v388_v19  ;;  %350 = vst.msk [vmem:[#allocation2 + $0x14] sm:$0xf] %vm344_vm2, %v392_v24  ;;  %v304_v29 = vsel %vm288_vm5, %v280_v13, %v296_v25  ;;  %v282_v30 = vadd.f32 %v378_v55, %v267_v22  ;;  %v286_v31 = vadd.f32 %v378_v55, %v271_v23 }
  0xd0   :  { %v387_v32 = vpack.c.bf16 %v304_v29, %v304_v29  ;;  %v308_v33 = vsel %vm292_vm6, %v284_v14, %v300_v26  ;;  %vm291_vm7 = vcmp.gt.f32.partialorder %v283_v27, 0.0  ;;  %v299_v34 = vmul.f32 0.01, %v283_v27 }
  0xd1   :  { %v391_v35 = vpack.c.bf16 %v308_v33, %v308_v33  ;;  %vm295_vm8 = vcmp.gt.f32.partialorder %v287_v28, 0.0  ;;  %v303_v36 = vmul.f32 0.01, %v287_v28  ;;  %vm290_vm9 = vcmp.gt.f32.partialorder %v282_v30, 0.0 }
  0xd2   :  { %345 = vst.msk [vmem:[#allocation2] sm:$0xf] %vm344_vm2, %v387_v32  ;;  %v307_v37 = vsel %vm291_vm7, %v283_v27, %v299_v34  ;;  %v298_v38 = vmul.f32 0.01, %v282_v30  ;;  %vm294_vm10 = vcmp.gt.f32.partialorder %v286_v31, 0.0 }
  0xd3   :  { %v302_v39 = vmul.f32 0.01, %v286_v31  ;;  %349 = vst.msk [vmem:[#allocation2 + $0x10] sm:$0xf] %vm344_vm2, %v391_v35  ;;  %v390_v40 = vpack.c.bf16 %v307_v37, %v307_v37  ;;  %v311_v41 = vsel %vm295_vm8, %v287_v28, %v303_v36 }
  0xd4   :  { %v394_v42 = vpack.c.bf16 %v311_v41, %v311_v41  ;;  %v306_v43 = vsel %vm290_vm9, %v282_v30, %v298_v38 }
  0xd5   :  { %v310_v44 = vsel %vm294_vm10, %v286_v31, %v302_v39  ;;  %348 = vst.msk [vmem:[#allocation2 + $0xc] sm:$0xf] %vm344_vm2, %v390_v40  ;;  %v389_v45 = vpack.c.bf16 %v306_v43, %v306_v43 }
  0xd6   :  { %v393_v46 = vpack.c.bf16 %v310_v44, %v310_v44  ;;  %352 = vst.msk [vmem:[#allocation2 + $0x1c] sm:$0xf] %vm344_vm2, %v394_v42 }
  0xd7   :  { %347 = vst.msk [vmem:[#allocation2 + $0x8] sm:$0xf] %vm344_vm2, %v389_v45 }
  0xd8   :  { %351 = vst.msk [vmem:[#allocation2 + $0x18] sm:$0xf] %vm344_vm2, %v393_v46 }
  0xd9   :  { %437 = shalt.err (!%p434_p4)
}
  0xda   :  { %s450_s9 = smov 64   ;;  %s451_s10 = smov 4  }
  0xdb   :  { %364 = dma.vmem_to_hbm [thread:$0]  %s359_s7, 512, %s572_s6, [#allocation3], %s450_s9, %s450_s9, %s451_s10  }
  0xdc   :  { %446 = dma.done.wait [#allocation3], 512  }
  0xdd   :  { %447 = vsyncadd [#allocation3], 4294966784 }
  0xde   :  { %368 = vsyncpa [#allocation3], 1 }

</bundles_post_ra>
